<compile_context>
chip_gen: v7x
topology: tpu7x:2x2x1
jax: 0.10.0
libtpu: 0.0.40
codegen_flags: <defaults>
</compile_context>

<pallas_src>
import functools

import jax
import jax.numpy as jnp
from jax import lax
from jax.experimental import pallas as pl
from jax.experimental.pallas import tpu as pltpu


# ---------------------------------------------------------------------------
# Kernel 1: per-batch, per-channel sum / sum-of-squares of y = w @ x
#           (y is recomputed later; only tiny stats go back to HBM)
# ---------------------------------------------------------------------------
def _conv_stats_kernel(w_ref, x_ref, sum_ref, sq_ref, *, hw, tile_s):
    s = pl.program_id(1)

    @pl.when(s == 0)
    def _init():
        sum_ref[...] = jnp.zeros_like(sum_ref)
        sq_ref[...] = jnp.zeros_like(sq_ref)

    # (C2, C1) @ (C1, tile_s) -> (C2, tile_s), f32 accumulation on the MXU.
    y = jnp.dot(w_ref[...], x_ref[0], preferred_element_type=jnp.float32)

    # Mask out-of-bounds columns of a ragged last tile (static no-op if divisible).
    if hw % tile_s != 0:
        col = s * tile_s + lax.broadcasted_iota(jnp.int32, y.shape, 1)
        y = jnp.where(col < hw, y, 0.0)

    sum_ref[0] += jnp.sum(y, axis=1, keepdims=True)      # (C2, 1)
    sq_ref[0] += jnp.sum(y * y, axis=1, keepdims=True)   # (C2, 1)


# ---------------------------------------------------------------------------
# Kernel 2: recompute y = w @ x, apply precomputed BN scale/shift, ReLU
# ---------------------------------------------------------------------------
def _conv_bn_relu_kernel(w_ref, scale_ref, shift_ref, x_ref, o_ref):
    y = jnp.dot(w_ref[...], x_ref[0], preferred_element_type=jnp.float32)
    out = jnp.maximum(y * scale_ref[...] + shift_ref[...], 0.0)
    o_ref[0] = out.astype(o_ref.dtype)


# ---------------------------------------------------------------------------
# Tiling helper: largest lane-dense spatial tile fitting the VMEM budget
# (double-buffered x block + double-buffered out block per column).
# ---------------------------------------------------------------------------
def _pick_spatial_tile(hw, c1, c2, itemsize, budget_bytes):
    per_col = 2 * (c1 + c2) * itemsize
    max_cols = max(budget_bytes // per_col, 128)
    if hw <= 128 or max_cols >= hw:
        return hw                      # full-extent block is always layout-legal
    return max(128, (int(max_cols) // 128) * 128)


# ---------------------------------------------------------------------------
# Wrapper: ConvModule.forward
# ---------------------------------------------------------------------------
def conv_module_forward(x, weight, gamma, beta, *, eps=1e-3,
                        vmem_tile_budget_bytes=16 * 1024 * 1024):
    """x: (N, C1, H, W);  weight: (C2, C1, 1, 1);  gamma/beta: (C2,)."""
    N, C1, H, W = x.shape
    C2 = weight.shape[0]
    HW = H * W

    # Free views only -- no transposes, no extra HBM passes.
    x3 = x.reshape(N, C1, HW)                      # (N, C1, HW), NCHW-native
    w = weight.reshape(C2, C1).astype(x.dtype)     # (C2, C1)

    tile_s = _pick_spatial_tile(HW, C1, C2, jnp.dtype(x.dtype).itemsize,
                                vmem_tile_budget_bytes)
    n_s = pl.cdiv(HW, tile_s)
    vmem_limit = 40 * 1024 * 1024                  # < 64 MiB physical on v7x

    # --- Kernel 1: conv-as-matmul stats (per-batch partials, no y writeback) ---
    sum_p, sq_p = pl.pallas_call(
        functools.partial(_conv_stats_kernel, hw=HW, tile_s=tile_s),
        out_shape=(
            jax.ShapeDtypeStruct((N, C2, 1), jnp.float32),
            jax.ShapeDtypeStruct((N, C2, 1), jnp.float32),
        ),
        grid=(N, n_s),
        in_specs=[
            pl.BlockSpec((C2, C1), lambda n, s: (0, 0)),            # weight (resident)
            pl.BlockSpec((1, C1, tile_s), lambda n, s: (n, 0, s)),  # x tile
        ],
        out_specs=(
            pl.BlockSpec((1, C2, 1), lambda n, s: (n, 0, 0)),       # per-batch sum acc
            pl.BlockSpec((1, C2, 1), lambda n, s: (n, 0, 0)),       # per-batch sumsq acc
        ),
        compiler_params=pltpu.CompilerParams(
            dimension_semantics=("parallel", "arbitrary"),
            vmem_limit_bytes=vmem_limit),
    )(w, x3)

    # --- Tiny cross-batch reduction + BN scale/shift precompute (wrapper-side) ---
    m = float(N * HW)
    ch_sum = jnp.sum(sum_p[:, :, 0], axis=0)                        # (C2,)
    ch_sq = jnp.sum(sq_p[:, :, 0], axis=0)                          # (C2,)
    mean = ch_sum / m
    # Biased variance (PyTorch train-mode BN); clamp guards E[y^2]-E[y]^2 cancellation.
    var = jnp.maximum(ch_sq / m - mean * mean, 0.0)
    scale1 = gamma.astype(jnp.float32) * lax.rsqrt(var + eps)       # (C2,)
    shift1 = beta.astype(jnp.float32) - mean * scale1               # (C2,)
    scale = scale1.reshape(C2, 1)
    shift = shift1.reshape(C2, 1)

    # --- Kernel 2: recompute conv, fused BN (scale/shift) + ReLU, lane-dense out ---
    out3 = pl.pallas_call(
        _conv_bn_relu_kernel,
        out_shape=jax.ShapeDtypeStruct((N, C2, HW), x.dtype),
        grid=(N, n_s),
        in_specs=[
            pl.BlockSpec((C2, C1), lambda n, s: (0, 0)),            # weight (resident)
            pl.BlockSpec((C2, 1), lambda n, s: (0, 0)),             # scale (resident)
            pl.BlockSpec((C2, 1), lambda n, s: (0, 0)),             # shift (resident)
            pl.BlockSpec((1, C1, tile_s), lambda n, s: (n, 0, s)),  # x tile
        ],
        out_specs=pl.BlockSpec((1, C2, tile_s), lambda n, s: (n, 0, s)),
        compiler_params=pltpu.CompilerParams(
            dimension_semantics=("parallel", "parallel"),
            vmem_limit_bytes=vmem_limit),
    )(w, scale, shift, x3)

    return out3.reshape(N, C2, H, W)               # free reshape back to NCHW


# ---------------------------------------------------------------------------
# Pure-JAX reference (PyTorch semantics) for the correctness check
# ---------------------------------------------------------------------------
def conv_module_ref(x, weight, gamma, beta, eps=1e-3):
    C2, C1 = weight.shape[0], weight.shape[1]
    w = weight.reshape(C2, C1)
    y = jnp.einsum("nchw,oc->nohw", x, w)
    mean = jnp.mean(y, axis=(0, 2, 3), keepdims=True)
    var = jnp.mean((y - mean) ** 2, axis=(0, 2, 3), keepdims=True)  # biased (training BN)
    yhat = (y - mean) / jnp.sqrt(var + eps)
    yhat = yhat * gamma.reshape(1, -1, 1, 1) + beta.reshape(1, -1, 1, 1)
    return jnp.maximum(yhat, 0.0)


if __name__ == "__main__":
    key = jax.random.PRNGKey(0)
    k_x, k_w, k_g, k_b = jax.random.split(key, 4)

    N, C1, H, W = 2, 4, 16, 16
    C2 = 8

    x = jax.random.normal(k_x, (N, C1, H, W), dtype=jnp.float32)
    weight = jax.random.normal(k_w, (C2, C1, 1, 1), dtype=jnp.float32) * 0.1
    gamma = 1.0 + 0.1 * jax.random.normal(k_g, (C2,), dtype=jnp.float32)
    beta = 0.1 * jax.random.normal(k_b, (C2,), dtype=jnp.float32)

    out = conv_module_forward(x, weight, gamma, beta)
    out = jax.block_until_ready(out)

    ref = conv_module_ref(x, weight, gamma, beta)
    assert out.shape == (N, C2, H, W)
    assert jnp.allclose(out, ref, atol=2e-4, rtol=2e-4), "mismatch vs reference"

    print("KERNEL_OK")
</pallas_src>

<mosaic_0001>
module attributes {stable_mosaic.version = 11 : i64} {
  func.func @_conv_stats_kernel(%arg0: i32, %arg1: i32, %arg2: memref<8x4xf32, #tpu.memory_space<vmem>>, %arg3: memref<1x4x256xf32, #tpu.memory_space<vmem>>, %arg4: memref<1x8x1xf32, #tpu.memory_space<vmem>>, %arg5: memref<1x8x1xf32, #tpu.memory_space<vmem>>) attributes {dimension_semantics = [#tpu.dimension_semantics<parallel>, #tpu.dimension_semantics<arbitrary>], iteration_bounds = array<i64: 2, 1>, scalar_prefetch = 0 : i64, scratch_operands = 0 : i64, tpu.core_type = #tpu.core_type<tc>, window_params = [{pipeline_mode = #tpu.pipeline_mode<synchronous>, transform_indices = @transform_0, window_bounds = array<i64: 8, 4>}, {transform_indices = @transform_1, window_bounds = array<i64: 1, 4, 256>}, {transform_indices = @transform_2, window_bounds = array<i64: 1, 8, 1>}, {transform_indices = @transform_3, window_bounds = array<i64: 1, 8, 1>}]} {
    %c0_i32 = arith.constant 0 : i32
    %0 = arith.cmpi eq, %arg1, %c0_i32 : i32
    %1 = arith.extui %0 : i1 to i32
    %c0_i32_0 = arith.constant 0 : i32
    %2 = arith.cmpi ne, %1, %c0_i32_0 : i32
    scf.if %2 {
      %cst_19 = arith.constant 0.000000e+00 : f32
      %24 = vector.broadcast %cst_19 : f32 to vector<1x8x1xf32>
      %c0_20 = arith.constant 0 : index
      %c0_21 = arith.constant 0 : index
      %c0_22 = arith.constant 0 : index
      %25 = vector.load %arg4[%c0_20, %c0_21, %c0_22] : memref<1x8x1xf32, #tpu.memory_space<vmem>>, vector<1x8x1xf32>
      tpu.vector_store %arg4[%c0_20, %c0_21, %c0_22], %24 {strides = array<i32>} : memref<1x8x1xf32, #tpu.memory_space<vmem>>, vector<1x8x1xf32>,
      %cst_23 = arith.constant 0.000000e+00 : f32
      %26 = vector.broadcast %cst_23 : f32 to vector<1x8x1xf32>
      %c0_24 = arith.constant 0 : index
      %c0_25 = arith.constant 0 : index
      %c0_26 = arith.constant 0 : index
      %27 = vector.load %arg5[%c0_24, %c0_25, %c0_26] : memref<1x8x1xf32, #tpu.memory_space<vmem>>, vector<1x8x1xf32>
      tpu.vector_store %arg5[%c0_24, %c0_25, %c0_26], %26 {strides = array<i32>} : memref<1x8x1xf32, #tpu.memory_space<vmem>>, vector<1x8x1xf32>,
    } else {
    }
    %c0 = arith.constant 0 : index
    %c0_1 = arith.constant 0 : index
    %3 = vector.load %arg2[%c0, %c0_1] : memref<8x4xf32, #tpu.memory_space<vmem>>, vector<8x4xf32>
    %c0_2 = arith.constant 0 : index
    %c0_3 = arith.constant 0 : index
    %c0_4 = arith.constant 0 : index
    %4 = vector.load %arg3[%c0_2, %c0_3, %c0_4] : memref<1x4x256xf32, #tpu.memory_space<vmem>>, vector<1x4x256xf32>
    %5 = vector.shape_cast %4 : vector<1x4x256xf32> to vector<4x256xf32>
    %cst = arith.constant dense<0.000000e+00> : vector<8x256xf32>
    %6 = tpu.matmul %3, %5, %cst {dimension_numbers = #tpu.dot_dimension_numbers<[1], [0], [0], [1], [0, 0, 1, 1], [], []>} : vector<8x4xf32>, vector<4x256xf32>, vector<8x256xf32> -> vector<8x256xf32>
    %c0_5 = arith.constant 0 : index
    %c0_6 = arith.constant 0 : index
    %c0_7 = arith.constant 0 : index
    %7 = vector.load %arg4[%c0_5, %c0_6, %c0_7] : memref<1x8x1xf32, #tpu.memory_space<vmem>>, vector<1x8x1xf32>
    %8 = vector.shape_cast %7 : vector<1x8x1xf32> to vector<8x1xf32>
    %cst_8 = arith.constant dense<0.000000e+00> : vector<8xf32>
    %9 = vector.multi_reduction <add>, %6, %cst_8 [1] : vector<8x256xf32> to vector<8xf32>
    %10 = vector.shape_cast %9 : vector<8xf32> to vector<8x1xf32>
    %11 = arith.addf %8, %10 : vector<8x1xf32>
    %c0_9 = arith.constant 0 : index
    %c0_10 = arith.constant 0 : index
    %c0_11 = arith.constant 0 : index
    %12 = vector.load %arg4[%c0_9, %c0_10, %c0_11] : memref<1x8x1xf32, #tpu.memory_space<vmem>>, vector<1x8x1xf32>
    %13 = vector.shape_cast %12 : vector<1x8x1xf32> to vector<8x1xf32>
    %14 = vector.shape_cast %11 : vector<8x1xf32> to vector<1x8x1xf32>
    tpu.vector_store %arg4[%c0_9, %c0_10, %c0_11], %14 {strides = array<i32>} : memref<1x8x1xf32, #tpu.memory_space<vmem>>, vector<1x8x1xf32>,
    %c0_12 = arith.constant 0 : index
    %c0_13 = arith.constant 0 : index
    %c0_14 = arith.constant 0 : index
    %15 = vector.load %arg5[%c0_12, %c0_13, %c0_14] : memref<1x8x1xf32, #tpu.memory_space<vmem>>, vector<1x8x1xf32>
    %16 = vector.shape_cast %15 : vector<1x8x1xf32> to vector<8x1xf32>
    %17 = arith.mulf %6, %6 : vector<8x256xf32>
    %cst_15 = arith.constant dense<0.000000e+00> : vector<8xf32>
    %18 = vector.multi_reduction <add>, %17, %cst_15 [1] : vector<8x256xf32> to vector<8xf32>
    %19 = vector.shape_cast %18 : vector<8xf32> to vector<8x1xf32>
    %20 = arith.addf %16, %19 : vector<8x1xf32>
    %c0_16 = arith.constant 0 : index
    %c0_17 = arith.constant 0 : index
    %c0_18 = arith.constant 0 : index
    %21 = vector.load %arg5[%c0_16, %c0_17, %c0_18] : memref<1x8x1xf32, #tpu.memory_space<vmem>>, vector<1x8x1xf32>
    %22 = vector.shape_cast %21 : vector<1x8x1xf32> to vector<8x1xf32>
    %23 = vector.shape_cast %20 : vector<8x1xf32> to vector<1x8x1xf32>
    tpu.vector_store %arg5[%c0_16, %c0_17, %c0_18], %23 {strides = array<i32>} : memref<1x8x1xf32, #tpu.memory_space<vmem>>, vector<1x8x1xf32>,
    return
  }
  func.func @transform_0(%arg0: i32, %arg1: i32) -> (i32, i32) {
    %c0_i32 = arith.constant 0 : i32
    %c0_i32_0 = arith.constant 0 : i32
    %c0_i32_1 = arith.constant 0 : i32
    return %c0_i32, %c0_i32_0 : i32, i32
  }
  func.func @transform_1(%arg0: i32, %arg1: i32) -> (i32, i32, i32) {
    %c0_i32 = arith.constant 0 : i32
    %c0_i32_0 = arith.constant 0 : i32
    return %arg0, %c0_i32, %arg1 : i32, i32, i32
  }
  func.func @transform_2(%arg0: i32, %arg1: i32) -> (i32, i32, i32) {
    %c0_i32 = arith.constant 0 : i32
    %c0_i32_0 = arith.constant 0 : i32
    %c0_i32_1 = arith.constant 0 : i32
    return %arg0, %c0_i32, %c0_i32_0 : i32, i32, i32
  }
  func.func @transform_3(%arg0: i32, %arg1: i32) -> (i32, i32, i32) {
    %c0_i32 = arith.constant 0 : i32
    %c0_i32_0 = arith.constant 0 : i32
    %c0_i32_1 = arith.constant 0 : i32
    return %arg0, %c0_i32, %c0_i32_0 : i32, i32, i32
  }
}

</mosaic_0001>

<bundles_post_ra>
// kernel: tpu_custom_call.1
= control target key start
LH: loop header
LB: loop body
LE: loop exit
PB: predicated region body
PF: predicated region fallthrough
CT: control target
= control target key end

     0   :  { %9 = vsyncpa [#allocation3], 0  ;;  %s741_s0 = inlined_call_operand.vmem [shape: f32[8,4], index: 0, kind: input, shape index: {}]   ;;  %s742_s1 = inlined_call_operand.hbm [shape: f32[2,4,256], index: 1, kind: input, shape index: {}]   ;;  %s743_s2 = inlined_call_operand.vmem [shape: f32[2,8,1], index: 2, kind: output, shape index: {0}]   ;;  %s744_s3 = inlined_call_operand.vmem [shape: f32[2,8,1], index: 3, kind: output, shape index: {1}]  }
   0x1   :  { %11 = vsyncpa [#allocation3 + $0x1], 0  ;;  %s606_s12 = smov 0   ;;  %s608_s13 = smov 0  }
   0x2   :  { %s610_s14 = smov 0   ;;  %s612_s15 = smov 0  }
   0x3   :  { %s614_s16 = smov 0   ;;  %s616_s17 = smov 0  }
   0x4 LB: > { %s428_s18 = sadd.s32 4294967295, %s582_s17   ;;  %s29_s19 = sadd.s32 1, %s578_s16  ;;  %s582_s17 = sphi %s616_s17, %s17_s17   ;;  %s578_s16 = sphi %s614_s16, %s754_s16   ;;  %s574_s15 = sphi %s612_s15, %s753_s15   ;;  %s570_s14 = sphi %s610_s14, %s752_s14   ;;  %s566_s13 = sphi %s608_s13, %s751_s13   ;;  %s562_s12 = sphi %s606_s12, %s750_s12  }
   0x5   : > { %p31_p0 = scmp.ge.s32.totalorder %s29_s19, 2  ;;  %s59_s20 = sadd.s32 1, %s570_s14 }
   0x6   : > { %p66_p1 = scmp.ne.s32.totalorder %s570_s14, %s566_s13  ;;  %p67_p2 = scmp.eq.s32.totalorder %s582_s17, 0 }
   0x7   : > { %s756_s19 = smov (%p31_p0, %s29_s19), 0  ;;  %p72_p4 = scmp.ne.s32.totalorder %s566_s13, %s562_s12 }
   0x8   : > { %p642_p3 = por %p67_p2, %p66_p1  ;;  %s54_s22 = ssub.s32 %s578_s16, %s756_s19 }
   0x9   : > { %p73_p5 = scmp.eq.s32.totalorder %s428_s18, 0  ;;  %p57_p6 = scmp.eq.s32.totalorder %s54_s22, 0 }
   0xa   : > { %p451_p8 = scmp.lt.s32.totalorder %s582_s17, 2  ;;  %s151_s25 = sand.u32 1, %s570_s14  }
   0xb   : > { %p649_p7 = por %p73_p5, %p72_p4  ;;  %s444_s26 = sshll.u32 %s578_s16, 7 }
   0xc   : > { %s655_s24 = scalar_select %p57_p6, %s570_s14, %s59_s20  }
   0xd   : > { %s432_s27 = sshll.u32 %s151_s25, 3  ;;  %s662_s30 = scalar_lea.hbm %s742_s1, %s444_s26 }
   0xe   : > { %s155_s4 = scalar_lea.vmem [#allocation2], %s432_s27  ;;  %p666_p9 = pnand %p451_p8, %p642_p3 }
   0xf   : > { %s165_s5 = sshll.u32 %s155_s4, 4  ;;  %s152_s7 = scalar_lea.sflag [#allocation3], %s151_s25  ;;  %s670_s5 = int_to_ptr.vmem [resolvable:$true] %s165_s5 }
  0x10   : > { %s502_s8 = scalar_lea.hbm %s662_s30, 128  ;;  %p504_p13 = pneg %p666_p9 }
  0x11   : > { %p503_p12 = scmp.ne.s32.totalorder %s662_s30, %s502_s8  ;;  %s507_s11 = scalar_lea.hbm %s742_s1, 256 }
  0x12   : > { %p508_p2 = scmp.lt.u32.totalorder %s662_s30, %s742_s1  ;;  %p509_p3 = scmp.lt.u32.totalorder %s507_s11, %s502_s8 }
  0x13   : > { %p505_p0 = pnand %p504_p13, %p503_p12  ;;  %p511_p5 = scmp.lt.u32.totalorder %s502_s8, %s662_s30 }
  0x14   : > { %p510_p4 = por %p509_p3, %p508_p2 }
  0x15   : > { %p506_p1 = pneg %p505_p0 }
  0x16   : > { %p512_p6 = por %p511_p5, %p510_p4 }
  0x18   : > { %p513_p8 = pnand %p512_p6, %p506_p1 }
  0x1a   : > { %516 = shalt.err (!%p513_p8)
}
  0x1b   : > { %s517_s20 = scalar_lea.vmem %s670_s5, 128  ;;  %s584_s21 = smov [#allocation2]  }
  0x1c   : > { %p518_p12 = scmp.ne.s32.totalorder %s670_s5, %s517_s20  ;;  %s522_s22 = sshll.u32 %s584_s21, 4  ;;  %s523_s22 = int_to_ptr.vmem [resolvable:$false] %s522_s22 }
  0x1d   : > { %s524_s25 = scalar_lea.vmem %s523_s22, 256  ;;  %p525_p11 = scmp.lt.s32.totalorder %s670_s5, %s523_s22 }
  0x1e   : > { %p520_p0 = pnand %p518_p12, %p504_p13  ;;  %p526_p2 = scmp.lt.s32.totalorder %s524_s25, %s517_s20 }
  0x20   : > { %p521_p10 = pneg %p520_p0  ;;  %p527_p3 = por %p526_p2, %p525_p11 }
  0x22   : > { %p528_p4 = pnand %p527_p3, %p521_p10 }
  0x24   : > { %531 = shalt.err (!%p528_p4)
}
  0x25   : > { %450 = dma.hbm_to_vmem [thread:$0]  (!%p666_p9), %s662_s30, 128, %s670_s5, %s152_s7  }
  0x26   : > { %p748_p1 = scmp.lt.s32.totalorder %s582_s17, 3  ;;  %p749_p5 = scmp.ge.s32.totalorder %s582_s17, 1 }
  0x28   : > { %p171_p13 = pnand %p749_p5, %p748_p1 }
  0x29   : > { %s176_s26 = sand.u32 (!%p171_p13), 1, %s566_s13  }
  0x2a   : > { %174 = sbr.rel (%p171_p13) target bundleno = 419 (0x1a3), region = 28  ;;  %s436_s27 = sshll.u32 (!%p171_p13), %s176_s26, 3 }
  0x2b   : > { %s177_s28 = scalar_lea.sflag (!%p171_p13), [#allocation3], %s176_s26  ;;  %s180_s29 = scalar_lea.vmem (!%p171_p13), [#allocation2], %s436_s27 }
  0x31   : > { %557 = dma.done.wait (%p649_p7), %s177_s28, 128  }
  0x32   : > { %559 = vsyncadd (%p649_p7), %s177_s28, 4294967168  ;;  %v585_v0 = vmov 0.0   ;;  %v223_v1 = vld [vmem:[%s180_s29] sm:$0xff]  ;;  %vm230_vm0 = vcmask 1043456   ;;  %vm226_vm1 = vcmask 31744   ;;  %p207_p9 = scmp.lt.s32.totalorder %s574_s15, 1 }
  0x33   : > { %299 = vmatprep.mubr.f32.mxu0 %v585_v0  ;;  %v225_v2 = vcombine.high %v223_v1, %v223_v1  ;;  %v222_v3 = vld [vmem:[%s741_s0] sm:$0xff]  ;;  %vm219_vm2 = vcmask 7168  }
  0x34   : > { %s758_s15 = smov (!%p207_p9, %s574_s15), 1 }
  0x35   : > { %439 = vmatprep.subr.msk.mxu0 %vm230_vm0, %v225_v2  ;;  %s437_s23 = sshll.u32 %s758_s15, 3 }
  0x36   : > { %440 = vmatpush1.msk.msra.mxu0 %vm230_vm0, %v223_v1  ;;  %s210_s7 = scalar_lea.vmem %s743_s2, %s437_s23  ;;  %s214_s10 = scalar_lea.vmem %s744_s3, %s437_s23 }
  0x37   : > { %441 = vmatmul.mubr.msk.f32.vlgmr.msra.gmra.mrb[0].mxu0 %vm226_vm1, %v222_v3  ;;  %220 = vst.msk [vmem:[%s210_s7] sm:$0xff] %vm219_vm2, %v585_v0  ;;  %221 = vst.msk [vmem:[%s214_s10] sm:$0xff] %vm219_vm2, %v585_v0 }
  0x3e   : > { %v306_v10 = vld [vmem:[%s210_s7] sm:$0xff] }
  0x3f   : > { %v313_v13 = vld [vmem:[%s214_s10] sm:$0xff] }
 0x10a   : > { %v301_v4 = vpop.f32.mrb[0].mxu0 }
 0x10b   : > { %v314_v5 = vmul.f32 %v301_v4, %v301_v4  ;;  %v303_v6 = vpop.f32.mrb[1].mxu0 }
 0x10c   : > { %v315_v7 = vmul.f32 %v303_v6, %v303_v6  ;;  %v307_v8 = vadd.f32 %v303_v6, %v301_v4 }
 0x10e   : > { %308 = vadd.xlane.f32.xlu0 %v307_v8  ;;  %v316_v9 = vadd.f32 %v315_v7, %v314_v5 }
 0x112   : > { %317 = vadd.xlane.f32.xlu0 %v316_v9 }
 0x19b   : > { %v309_v11 = vpop.xlane.xlu0 %308 }
 0x19c   : > { %v310_v12 = vadd.f32 %v309_v11, %v306_v10 }
 0x19e   : > { %312 = vst.msk [vmem:[%s210_s7] sm:$0xff] %vm219_vm2, %v310_v12 }
 0x19f   : > { %v318_v14 = vpop.xlane.xlu0 %317 }
 0x1a0   : > { %v319_v15 = vadd.f32 %v318_v14, %v313_v13 }
 0x1a2   : > { %320 = vst.msk [vmem:[%s214_s10] sm:$0xff] %vm219_vm2, %v319_v15 }
 0x1a3 PF: > { %s17_s17 = sadd.s32 1, %s582_s17   ;;  %s750_s12 = smov %s566_s13 }
 0x1a4   : > { %p14_p7 = scmp.ge.s32.totalorder %s17_s17, 4   ;;  %s751_s13 = smov %s570_s14 }
 0x1a5   : > { %s752_s14 = smov %s655_s24  ;;  %s753_s15 = smov %s578_s16 }
 0x1a6   : > { %s754_s16 = smov %s756_s19  ;;  %16 = sbr.rel (!%p14_p7) target bundleno = 4 (0x4), region = 84 }
 0x1ad   :  { %354 = vsyncpa [#allocation3], 1 }
 0x1ae   :  { %356 = vsyncpa [#allocation3 + $0x1], 1 }

</bundles_post_ra>
